<compile_context>
chip_gen: v7x
topology: tpu7x:2x2x1
jax: 0.10.0
libtpu: 0.0.40
codegen_flags: <defaults>
</compile_context>

<pallas_src>
import jax
import jax.numpy as jnp
from jax.experimental import pallas as pl
from jax.experimental.pallas import tpu as pltpu


# ----------------------------- kernel -------------------------------------- #

def _fused_heads_kernel(feats_ref, ctr_ref,
                        w1_ref, b1_ref, w2_ref, b2_ref, wc_ref, bc_ref,
                        aux_ref, out_ref):
    """One (batch, pixel-tile) step of both segmentation heads.

    feats_ref: (1, 128, TP) bf16   ctr_ref: (1, 256, TP) bf16
    w1_ref:   (64, 128) bf16  b1_ref: (64, 1) f32     # BN already folded in
    w2_ref:   (NC, 64) bf16   b2_ref: (NC, 1) f32
    wc_ref:   (NC, 256) bf16  bc_ref: (NC, 1) f32
    aux_ref / out_ref: (1, NC, TP) f32                # pixels on the lane axis
    """
    # --- aux head: conv1x1 (+folded BN) -> ReLU -> conv1x1 ---
    x = feats_ref[0]                                                   # (128, TP)
    h = jnp.dot(w1_ref[...], x, preferred_element_type=jnp.float32)   # (64, TP) f32
    h = jnp.maximum(h + b1_ref[...], 0.0)
    # Cast the intermediate back to the MXU input dtype: bounds the (64, TP)
    # VMEM scratch at large pixel tiles and keeps the second dot on the fast path.
    ya = jnp.dot(w2_ref[...], h.astype(w2_ref.dtype),
                 preferred_element_type=jnp.float32)                   # (NC, TP)
    aux_ref[0] = (ya + b1_like(b2_ref)).astype(aux_ref.dtype)

    # --- cls head: conv1x1 ---
    c = ctr_ref[0]                                                     # (256, TP)
    yc = jnp.dot(wc_ref[...], c, preferred_element_type=jnp.float32)  # (NC, TP)
    out_ref[0] = (yc + b1_like(bc_ref)).astype(out_ref.dtype)


def b1_like(b_ref):
    # tiny helper: load the (C, 1) bias block; broadcasts over the lane axis.
    return b_ref[...]


# ----------------------------- tiling -------------------------------------- #

def _round128(v):
    return max(128, (v // 128) * 128)


def _pick_pixel_tile(hw, n, in_itemsize, nc, c_f, c_c, c_mid,
                     vmem_budget_bytes=20 << 20, hard_cap=16384, min_steps=4):
    """Pick the pixel-tile size TP (multiple of 128).

    - Sized so the double-buffered inputs/outputs + intermediates fit a
      conservative VMEM budget (safe on v7x's 64 MiB physical VMEM).
    - Prefers a tile that exactly divides the 128-padded pixel count when one
      exists at >= half the cap (avoids the wrapper-side pad copy); otherwise a
      near-cap tile + padding is used so awkward H*W never collapses to TP=128.
    - Guarantees >= min_steps total grid steps so both v7x TensorCores keep
      their pipelines full (>= 2 steps per core).
    """
    # bytes of VMEM consumed per pixel of tile (double-buffered ins/outs + scratch)
    per_px = (2 * (c_f + c_c) * in_itemsize          # input tiles, double-buffered
              + 2 * 2 * nc * 4                        # two f32 output tiles, dbl-buffered
              + c_mid * (4 + in_itemsize)             # h (f32) + h cast (bf16)
              + 2 * nc * 4)                           # ya / yc f32 temporaries
    cap = _round128(min(hard_cap, max(128, vmem_budget_bytes // per_px)))

    hw128 = pl.cdiv(hw, 128) * 128
    tp = _round128(min(hw128, cap))

    # Prefer an exact divisor of the 128-padded pixel count if it is not much
    # smaller than the cap (avoids padding without collapsing the tile).
    t = tp
    best_div = 0
    while t >= 128:
        if hw128 % t == 0:
            best_div = t
            break
        t -= 128
    if best_div >= tp // 2:
        tp = best_div

    # Ensure enough grid steps for per-core double-buffering on v7x.
    while tp > 128 and n * pl.cdiv(hw128, tp) < min_steps:
        tp = _round128(tp // 2)
    return tp


def _vmem_limit_bytes(tp, nc, c_f, c_c, c_mid, in_itemsize):
    est = (2 * (c_f + c_c) * tp * in_itemsize
           + 2 * 2 * nc * tp * 4
           + c_mid * tp * (4 + in_itemsize)
           + 2 * nc * tp * 4
           + 4 << 20)                                  # slack for weights/compiler scratch
    # >= 32 MiB so v5e's 16 MiB default never constrains us; <= 48 MiB so we
    # always leave headroom under v7x's 64 MiB physical VMEM.
    return int(min(max(est, 32 << 20), 48 << 20))


# ----------------------------- params -------------------------------------- #

def prepare_head_params(raw_params, eps=1e-5, compute_dtype=jnp.bfloat16):
    """One-time preprocessing: fold BN into conv1, transpose all 1x1-conv
    weights to (out, in), and cast weights to the MXU compute dtype.
    Biases stay f32 (added post-accumulation)."""
    w1, b1, gamma, beta, mean, var, w2, b2 = raw_params["aux"]
    wc, bc = raw_params["cls"]
    s = gamma / jnp.sqrt(var + eps)
    w1_eff = w1 * s[None, :]                       # (128, 64), (in, out)
    b1_eff = b1 * s + (beta - mean * s)            # (64,)
    return (
        jnp.transpose(w1_eff).astype(compute_dtype),   # (64, 128)
        b1_eff.reshape(-1, 1).astype(jnp.float32),     # (64, 1)
        jnp.transpose(w2).astype(compute_dtype),       # (NC, 64)
        b2.reshape(-1, 1).astype(jnp.float32),         # (NC, 1)
        jnp.transpose(wc).astype(compute_dtype),       # (NC, 256)
        bc.reshape(-1, 1).astype(jnp.float32),         # (NC, 1)
    )


# ----------------------------- wrapper -------------------------------------- #

def ohybridcr_heads_pallas(feats_nchw, ctr_nchw, head_params):
    """Fused aux_head + cls_head. Inputs NCHW, outputs NCHW (num_classes ch, f32)."""
    n, c_f, h, w = feats_nchw.shape
    _, c_c, h2, w2_ = ctr_nchw.shape
    assert (h, w) == (h2, w2_) and ctr_nchw.shape[0] == n
    hw = h * w

    w1_t, b1, w2_t, b2, wc_t, bc = head_params
    compute_dtype = w1_t.dtype
    in_itemsize = jnp.dtype(compute_dtype).itemsize
    c_mid = w1_t.shape[0]
    nc = w2_t.shape[0]

    tp = _pick_pixel_tile(hw, n, in_itemsize, nc, c_f, c_c, c_mid)
    hw_pad = pl.cdiv(hw, tp) * tp
    grid = (n, hw_pad // tp)

    # Free, contiguous reshapes; cast to the bf16 compute dtype at the boundary.
    # TODO(synk): in production the backbone should already emit bf16 so this
    # cast fuses away instead of costing an extra HBM pass.
    feats = feats_nchw.reshape(n, c_f, hw).astype(compute_dtype)
    ctr = ctr_nchw.reshape(n, c_c, hw).astype(compute_dtype)
    if hw_pad != hw:
        pad = hw_pad - hw
        feats = jnp.pad(feats, ((0, 0), (0, 0), (0, pad)))
        ctr = jnp.pad(ctr, ((0, 0), (0, 0), (0, pad)))

    out_aux, out = pl.pallas_call(
        _fused_heads_kernel,
        out_shape=(
            jax.ShapeDtypeStruct((n, nc, hw_pad), jnp.float32),
            jax.ShapeDtypeStruct((n, nc, hw_pad), jnp.float32),
        ),
        grid_spec=pltpu.PrefetchScalarGridSpec(
            num_scalar_prefetch=0,
            grid=grid,
            in_specs=[
                pl.BlockSpec((1, c_f, tp), lambda i, j: (i, 0, j)),
                pl.BlockSpec((1, c_c, tp), lambda i, j: (i, 0, j)),
                pl.BlockSpec((c_mid, c_f), lambda i, j: (0, 0)),
                pl.BlockSpec((c_mid, 1), lambda i, j: (0, 0)),
                pl.BlockSpec((nc, c_mid), lambda i, j: (0, 0)),
                pl.BlockSpec((nc, 1), lambda i, j: (0, 0)),
                pl.BlockSpec((nc, c_c), lambda i, j: (0, 0)),
                pl.BlockSpec((nc, 1), lambda i, j: (0, 0)),
            ],
            out_specs=[
                pl.BlockSpec((1, nc, tp), lambda i, j: (i, 0, j)),
                pl.BlockSpec((1, nc, tp), lambda i, j: (i, 0, j)),
            ],
        ),
        compiler_params=pltpu.CompilerParams(
            dimension_semantics=("parallel", "parallel"),
            vmem_limit_bytes=_vmem_limit_bytes(tp, nc, c_f, c_c, c_mid, in_itemsize),
        ),
    )(feats, ctr, w1_t, b1, w2_t, b2, wc_t, bc)

    if hw_pad != hw:
        out_aux = out_aux[:, :, :hw]
        out = out[:, :, :hw]
    return out_aux.reshape(n, nc, h, w), out.reshape(n, nc, h, w)


def ohybridcr_forward(feats, ctr_features, head_params):
    """Mirrors OHybridCR.forward (backbone='r18'): returns [out_aux, out].

    TODO(synk): self.resnet(x, mask) and self.ctrancnn(layers, edge) are not
    reproducible (their class definitions are missing from the reference);
    feats / ctr_features stand in for their outputs.
    """
    out_aux, out = ohybridcr_heads_pallas(feats, ctr_features, head_params)
    return [out_aux, out]


# ----------------------------- params / reference -------------------------- #

def init_params(key, num_classes):
    ks = jax.random.split(key, 6)
    aux = (
        0.05 * jax.random.normal(ks[0], (128, 64), jnp.float32),          # conv1 W (in,out)
        0.01 * jax.random.normal(ks[1], (64,), jnp.float32),              # conv1 b
        jnp.ones((64,), jnp.float32),                                      # BN gamma
        jnp.zeros((64,), jnp.float32),                                     # BN beta
        jnp.zeros((64,), jnp.float32),                                     # BN running mean
        jnp.ones((64,), jnp.float32),                                      # BN running var
        0.05 * jax.random.normal(ks[2], (64, num_classes), jnp.float32),   # conv2 W
        0.01 * jax.random.normal(ks[3], (num_classes,), jnp.float32),      # conv2 b
    )
    cls = (
        0.05 * jax.random.normal(ks[4], (256, num_classes), jnp.float32),  # cls W
        0.01 * jax.random.normal(ks[5], (num_classes,), jnp.float32),      # cls b
    )
    return {"aux": aux, "cls": cls}


def _reference_f32(feats, ctr, raw_params, eps=1e-5):
    """Exact f32 reference of the original module math (loose comparison)."""
    w1, b1, gamma, beta, mean, var, w2, b2 = raw_params["aux"]
    wc, bc = raw_params["cls"]

    def conv1x1(x_nchw, w_io, b_o):
        y = jnp.einsum("nchw,co->nohw", x_nchw, w_io)
        return y + b_o[None, :, None, None]

    h = conv1x1(feats, w1, b1)
    s = gamma / jnp.sqrt(var + eps)
    h = h * s[None, :, None, None] + (beta - mean * s)[None, :, None, None]
    h = jnp.maximum(h, 0.0)
    out_aux = conv1x1(h, w2, b2)
    out = conv1x1(ctr, wc, bc)
    return [out_aux, out]


def _reference_bf16(feats, ctr, head_params):
    """Reference mimicking the kernel's bf16 cast points (tight comparison)."""
    w1_t, b1, w2_t, b2, wc_t, bc = head_params
    n, c_f, h, w = feats.shape
    c_c = ctr.shape[1]
    nc = w2_t.shape[0]
    hw = h * w
    x = feats.reshape(n, c_f, hw).astype(w1_t.dtype)
    c = ctr.reshape(n, c_c, hw).astype(wc_t.dtype)
    hm = jnp.einsum("oc,ncp->nop", w1_t, x, preferred_element_type=jnp.float32)
    hm = jnp.maximum(hm + b1[None], 0.0)
    ya = jnp.einsum("oc,ncp->nop", w2_t, hm.astype(w2_t.dtype),
                    preferred_element_type=jnp.float32) + b2[None]
    yc = jnp.einsum("oc,ncp->nop", wc_t, c,
                    preferred_element_type=jnp.float32) + bc[None]
    return ya.reshape(n, nc, h, w), yc.reshape(n, nc, h, w)


# ----------------------------- main ---------------------------------------- #

if __name__ == "__main__":
    key = jax.random.PRNGKey(0)
    k_feats, k_ctr, k_params = jax.random.split(key, 3)

    N, H, W = 2, 16, 16
    NUM_CLASSES = 8

    # Stand-ins for backbone / ctrancnn outputs (see TODO above).
    feats = jax.random.normal(k_feats, (N, 128, H, W), jnp.float32)
    ctr_features = jax.random.normal(k_ctr, (N, 256, H, W), jnp.float32)

    raw_params = init_params(k_params, NUM_CLASSES)
    head_params = prepare_head_params(raw_params)   # BN fold + transposes + bf16 cast, once

    fwd = jax.jit(ohybridcr_forward)
    out_aux, out = fwd(feats, ctr_features, head_params)
    out_aux = jax.block_until_ready(out_aux)
    out = jax.block_until_ready(out)

    assert out_aux.shape == (N, NUM_CLASSES, H, W)
    assert out.shape == (N, NUM_CLASSES, H, W)

    # Tight check: same bf16 cast points as the kernel.
    ref_aux_b, ref_out_b = _reference_bf16(feats, ctr_features, head_params)
    assert jnp.allclose(out_aux, ref_aux_b, atol=5e-3, rtol=5e-3)
    assert jnp.allclose(out, ref_out_b, atol=5e-3, rtol=5e-3)

    # Loose check: full-f32 original-module math (bf16 rounding tolerance).
    ref_aux, ref_out = _reference_f32(feats, ctr_features, raw_params)
    assert jnp.allclose(out_aux, ref_aux, atol=5e-2, rtol=5e-2)
    assert jnp.allclose(out, ref_out, atol=5e-2, rtol=5e-2)

    print("KERNEL_OK")
</pallas_src>

<mosaic_0001>
module attributes {stable_mosaic.version = 11 : i64} {
  func.func @_fused_heads_kernel(%arg0: i32, %arg1: i32, %arg2: memref<1x128x128xbf16, #tpu.memory_space<vmem>>, %arg3: memref<1x256x128xbf16, #tpu.memory_space<vmem>>, %arg4: memref<64x128xbf16, #tpu.memory_space<vmem>>, %arg5: memref<64x1xf32, #tpu.memory_space<vmem>>, %arg6: memref<8x64xbf16, #tpu.memory_space<vmem>>, %arg7: memref<8x1xf32, #tpu.memory_space<vmem>>, %arg8: memref<8x256xbf16, #tpu.memory_space<vmem>>, %arg9: memref<8x1xf32, #tpu.memory_space<vmem>>, %arg10: memref<1x8x128xf32, #tpu.memory_space<vmem>>, %arg11: memref<1x8x128xf32, #tpu.memory_space<vmem>>) attributes {dimension_semantics = [#tpu.dimension_semantics<parallel>, #tpu.dimension_semantics<parallel>], iteration_bounds = array<i64: 2, 2>, scalar_prefetch = 0 : i64, scratch_operands = 0 : i64, tpu.core_type = #tpu.core_type<tc>, window_params = [{transform_indices = @transform_0, window_bounds = array<i64: 1, 128, 128>}, {transform_indices = @transform_1, window_bounds = array<i64: 1, 256, 128>}, {pipeline_mode = #tpu.pipeline_mode<synchronous>, transform_indices = @transform_2, window_bounds = array<i64: 64, 128>}, {pipeline_mode = #tpu.pipeline_mode<synchronous>, transform_indices = @transform_3, window_bounds = array<i64: 64, 1>}, {pipeline_mode = #tpu.pipeline_mode<synchronous>, transform_indices = @transform_4, window_bounds = array<i64: 8, 64>}, {pipeline_mode = #tpu.pipeline_mode<synchronous>, transform_indices = @transform_5, window_bounds = array<i64: 8, 1>}, {pipeline_mode = #tpu.pipeline_mode<synchronous>, transform_indices = @transform_6, window_bounds = array<i64: 8, 256>}, {pipeline_mode = #tpu.pipeline_mode<synchronous>, transform_indices = @transform_7, window_bounds = array<i64: 8, 1>}, {transform_indices = @transform_8, window_bounds = array<i64: 1, 8, 128>}, {transform_indices = @transform_9, window_bounds = array<i64: 1, 8, 128>}]} {
    %c0 = arith.constant 0 : index
    %c0_0 = arith.constant 0 : index
    %c0_1 = arith.constant 0 : index
    %0 = vector.load %arg2[%c0, %c0_0, %c0_1] : memref<1x128x128xbf16, #tpu.memory_space<vmem>>, vector<1x128x128xbf16>
    %1 = vector.shape_cast %0 : vector<1x128x128xbf16> to vector<128x128xbf16>
    %c0_2 = arith.constant 0 : index
    %c0_3 = arith.constant 0 : index
    %2 = vector.load %arg4[%c0_2, %c0_3] : memref<64x128xbf16, #tpu.memory_space<vmem>>, vector<64x128xbf16>
    %cst = arith.constant dense<0.000000e+00> : vector<64x128xf32>
    %3 = tpu.matmul %2, %1, %cst {dimension_numbers = #tpu.dot_dimension_numbers<[1], [0], [0], [1], [0, 0, 1, 1], [], []>} : vector<64x128xbf16>, vector<128x128xbf16>, vector<64x128xf32> -> vector<64x128xf32>
    %c0_4 = arith.constant 0 : index
    %c0_5 = arith.constant 0 : index
    %4 = vector.load %arg5[%c0_4, %c0_5] : memref<64x1xf32, #tpu.memory_space<vmem>>, vector<64x1xf32>
    %5 = vector.broadcast %4 : vector<64x1xf32> to vector<64x128xf32>
    %6 = arith.addf %3, %5 : vector<64x128xf32>
    %cst_6 = arith.constant 0.000000e+00 : f32
    %7 = vector.broadcast %cst_6 : f32 to vector<64x128xf32>
    %8 = arith.maximumf %6, %7 : vector<64x128xf32>
    %c0_7 = arith.constant 0 : index
    %c0_8 = arith.constant 0 : index
    %9 = vector.load %arg6[%c0_7, %c0_8] : memref<8x64xbf16, #tpu.memory_space<vmem>>, vector<8x64xbf16>
    %10 = arith.truncf %8 : vector<64x128xf32> to vector<64x128xbf16>
    %cst_9 = arith.constant dense<0.000000e+00> : vector<8x128xf32>
    %11 = tpu.matmul %9, %10, %cst_9 {dimension_numbers = #tpu.dot_dimension_numbers<[1], [0], [0], [1], [0, 0, 1, 1], [], []>} : vector<8x64xbf16>, vector<64x128xbf16>, vector<8x128xf32> -> vector<8x128xf32>
    %c0_10 = arith.constant 0 : index
    %c0_11 = arith.constant 0 : index
    %12 = vector.load %arg7[%c0_10, %c0_11] : memref<8x1xf32, #tpu.memory_space<vmem>>, vector<8x1xf32>
    %13 = vector.broadcast %12 : vector<8x1xf32> to vector<8x128xf32>
    %14 = arith.addf %11, %13 : vector<8x128xf32>
    %c0_12 = arith.constant 0 : index
    %c0_13 = arith.constant 0 : index
    %c0_14 = arith.constant 0 : index
    %15 = vector.load %arg10[%c0_12, %c0_13, %c0_14] : memref<1x8x128xf32, #tpu.memory_space<vmem>>, vector<1x8x128xf32>
    %16 = vector.shape_cast %15 : vector<1x8x128xf32> to vector<8x128xf32>
    %17 = vector.shape_cast %14 : vector<8x128xf32> to vector<1x8x128xf32>
    tpu.vector_store %arg10[%c0_12, %c0_13, %c0_14], %17 {strides = array<i32>} : memref<1x8x128xf32, #tpu.memory_space<vmem>>, vector<1x8x128xf32>,
    %c0_15 = arith.constant 0 : index
    %c0_16 = arith.constant 0 : index
    %c0_17 = arith.constant 0 : index
    %18 = vector.load %arg3[%c0_15, %c0_16, %c0_17] : memref<1x256x128xbf16, #tpu.memory_space<vmem>>, vector<1x256x128xbf16>
    %19 = vector.shape_cast %18 : vector<1x256x128xbf16> to vector<256x128xbf16>
    %c0_18 = arith.constant 0 : index
    %c0_19 = arith.constant 0 : index
    %20 = vector.load %arg8[%c0_18, %c0_19] : memref<8x256xbf16, #tpu.memory_space<vmem>>, vector<8x256xbf16>
    %cst_20 = arith.constant dense<0.000000e+00> : vector<8x128xf32>
    %21 = tpu.matmul %20, %19, %cst_20 {dimension_numbers = #tpu.dot_dimension_numbers<[1], [0], [0], [1], [0, 0, 1, 1], [], []>} : vector<8x256xbf16>, vector<256x128xbf16>, vector<8x128xf32> -> vector<8x128xf32>
    %c0_21 = arith.constant 0 : index
    %c0_22 = arith.constant 0 : index
    %22 = vector.load %arg9[%c0_21, %c0_22] : memref<8x1xf32, #tpu.memory_space<vmem>>, vector<8x1xf32>
    %23 = vector.broadcast %22 : vector<8x1xf32> to vector<8x128xf32>
    %24 = arith.addf %21, %23 : vector<8x128xf32>
    %c0_23 = arith.constant 0 : index
    %c0_24 = arith.constant 0 : index
    %c0_25 = arith.constant 0 : index
    %25 = vector.load %arg11[%c0_23, %c0_24, %c0_25] : memref<1x8x128xf32, #tpu.memory_space<vmem>>, vector<1x8x128xf32>
    %26 = vector.shape_cast %25 : vector<1x8x128xf32> to vector<8x128xf32>
    %27 = vector.shape_cast %24 : vector<8x128xf32> to vector<1x8x128xf32>
    tpu.vector_store %arg11[%c0_23, %c0_24, %c0_25], %27 {strides = array<i32>} : memref<1x8x128xf32, #tpu.memory_space<vmem>>, vector<1x8x128xf32>,
    return
  }
  func.func @transform_0(%arg0: i32, %arg1: i32) -> (i32, i32, i32) {
    %c0_i32 = arith.constant 0 : i32
    %c0_i32_0 = arith.constant 0 : i32
    return %arg0, %c0_i32, %arg1 : i32, i32, i32
  }
  func.func @transform_1(%arg0: i32, %arg1: i32) -> (i32, i32, i32) {
    %c0_i32 = arith.constant 0 : i32
    %c0_i32_0 = arith.constant 0 : i32
    return %arg0, %c0_i32, %arg1 : i32, i32, i32
  }
  func.func @transform_2(%arg0: i32, %arg1: i32) -> (i32, i32) {
    %c0_i32 = arith.constant 0 : i32
    %c0_i32_0 = arith.constant 0 : i32
    %c0_i32_1 = arith.constant 0 : i32
    return %c0_i32, %c0_i32_0 : i32, i32
  }
  func.func @transform_3(%arg0: i32, %arg1: i32) -> (i32, i32) {
    %c0_i32 = arith.constant 0 : i32
    %c0_i32_0 = arith.constant 0 : i32
    %c0_i32_1 = arith.constant 0 : i32
    return %c0_i32, %c0_i32_0 : i32, i32
  }
  func.func @transform_4(%arg0: i32, %arg1: i32) -> (i32, i32) {
    %c0_i32 = arith.constant 0 : i32
    %c0_i32_0 = arith.constant 0 : i32
    %c0_i32_1 = arith.constant 0 : i32
    return %c0_i32, %c0_i32_0 : i32, i32
  }
  func.func @transform_5(%arg0: i32, %arg1: i32) -> (i32, i32) {
    %c0_i32 = arith.constant 0 : i32
    %c0_i32_0 = arith.constant 0 : i32
    %c0_i32_1 = arith.constant 0 : i32
    return %c0_i32, %c0_i32_0 : i32, i32
  }
  func.func @transform_6(%arg0: i32, %arg1: i32) -> (i32, i32) {
    %c0_i32 = arith.constant 0 : i32
    %c0_i32_0 = arith.constant 0 : i32
    %c0_i32_1 = arith.constant 0 : i32
    return %c0_i32, %c0_i32_0 : i32, i32
  }
  func.func @transform_7(%arg0: i32, %arg1: i32) -> (i32, i32) {
    %c0_i32 = arith.constant 0 : i32
    %c0_i32_0 = arith.constant 0 : i32
    %c0_i32_1 = arith.constant 0 : i32
    return %c0_i32, %c0_i32_0 : i32, i32
  }
  func.func @transform_8(%arg0: i32, %arg1: i32) -> (i32, i32, i32) {
    %c0_i32 = arith.constant 0 : i32
    %c0_i32_0 = arith.constant 0 : i32
    return %arg0, %c0_i32, %arg1 : i32, i32, i32
  }
  func.func @transform_9(%arg0: i32, %arg1: i32) -> (i32, i32, i32) {
    %c0_i32 = arith.constant 0 : i32
    %c0_i32_0 = arith.constant 0 : i32
    return %arg0, %c0_i32, %arg1 : i32, i32, i32
  }
}

</mosaic_0001>

<bundles_post_ra>
// kernel: ohybridcr_forward.1
= control target key start
LH: loop header
LB: loop body
LE: loop exit
PB: predicated region body
PF: predicated region fallthrough
CT: control target
= control target key end

     0   :  { %s1605_s30 = smov 0   ;;  %s1607_s10 = smov 0   ;;  %s1875_s0 = inlined_call_operand.vmem [shape: bf16[2,128,256], index: 0, kind: input, shape index: {}]   ;;  %s1876_s1 = inlined_call_operand.vmem [shape: bf16[2,256,256], index: 1, kind: input, shape index: {}]   ;;  %s1877_s2 = inlined_call_operand.vmem [shape: bf16[64,128], index: 2, kind: input, shape index: {}]   ;;  %s1878_s3 = inlined_call_operand.vmem [shape: f32[64,1], index: 3, kind: input, shape index: {}]   ;;  %s1879_s4 = inlined_call_operand.vmem [shape: bf16[8,64], index: 4, kind: input, shape index: {}]   ;;  %s1880_s5 = inlined_call_operand.vmem [shape: f32[8,1], index: 5, kind: input, shape index: {}]   ;;  %s1881_s6 = inlined_call_operand.vmem [shape: bf16[8,256], index: 6, kind: input, shape index: {}]   ;;  %s1882_s7 = inlined_call_operand.vmem [shape: f32[8,1], index: 7, kind: input, shape index: {}]   ;;  %s1883_s8 = inlined_call_operand.vmem [shape: f32[2,8,256], index: 8, kind: output, shape index: {0}]   ;;  %s1884_s9 = inlined_call_operand.vmem [shape: f32[2,8,256], index: 9, kind: output, shape index: {1}]  }
   0x1   :  { %s1609_s11 = smov 0   ;;  %s1611_s12 = smov 0  }
   0x2   :  { %s1613_s13 = smov 0   ;;  %s1615_s14 = smov 0  }
   0x3   :  { %s1617_s15 = smov 0  }
   0x4 LB: > { %s29_s16 = sadd.s32 1, %s1542_s13  ;;  %s32_s17 = sadd.s32 1, %s1546_s14  ;;  %s1550_s15 = sphi %s1617_s15, %s20_s15   ;;  %s1546_s14 = sphi %s1615_s14, %s1891_s14   ;;  %s1542_s13 = sphi %s1613_s13, %s1890_s13   ;;  %s1538_s12 = sphi %s1611_s12, %s1889_s12   ;;  %s1534_s11 = sphi %s1609_s11, %s1888_s11   ;;  %s1530_s10 = sphi %s1607_s10, %s1887_s10   ;;  %s1526_s30 = sphi %s1605_s30, %s1886_s30  }
   0x5   : > { %p30_p0 = scmp.ge.s32.totalorder %s29_s16, 2  ;;  %p48_p1 = scmp.ne.s32.totalorder %s1530_s10, %s1526_s30 }
   0x6   : > { %p49_p2 = scmp.eq.s32.totalorder %s1550_s15, 0  ;;  %s41_s22 = sadd.s32 1, %s1530_s10 }
   0x7   : > { %s1893_s16 = smov (%p30_p0, %s29_s16), 0  ;;  %s1895_s17 = smov (!%p30_p0, %s32_s17), %s1546_s14 }
   0x8   : > { %p1648_p3 = por %p49_p2, %p48_p1  ;;  %p34_p4 = scmp.ge.s32.totalorder %s1895_s17, 2 }
   0x9   : > { %s37_s19 = ssub.s32 %s1542_s13, %s1893_s16  ;;  %p1283_p6 = scmp.ge.s32.totalorder %s1550_s15, 4 }
   0xa   : > { %s1897_s17 = smov (%p34_p4, %s1895_s17), 0 }
   0xb   : > { %s36_s20 = ssub.s32 %s1546_s14, %s1897_s17  ;;  %302 = sbr.rel (%p1283_p6) target bundleno = 61 (0x3d), region = 40 }
   0xc   : > { %s38_s21 = sor.u32 %s37_s19, %s36_s20 }
   0xd   : > { %p39_p5 = scmp.eq.s32.totalorder %s38_s21, 0 }
   0xf   : > { %s1660_s23 = scalar_select %p39_p5, %s1530_s10, %s41_s22  }
  0x12   : > { %305 = sbr.rel (!%p1648_p3) target bundleno = 34 (0x22), region = 44  ;;  %s307_s24 = sand.u32 (%p1648_p3), 1, %s1530_s10  }
  0x13   : > { %s1285_s25 = sshll.u32 (%p1648_p3), %s1546_s14, 5  ;;  %s1284_s26 = sshll.u32 (%p1648_p3), %s307_s24, 6 }
  0x14   : > { %s311_s27 = sadd.s32 (%p1648_p3), %s1542_s13, %s1285_s25  ;;  %s309_s21 = scalar_lea.vmem (%p1648_p3), [#allocation2], %s1284_s26 }
  0x15   : > { %s1286_s28 = sshll.u32 (%p1648_p3), %s311_s27, 2 }
  0x16   : > { %s1671_s20 = scalar_lea.vmem (%p1648_p3), %s1875_s0, %s1286_s28 }
  0x17   : > { %v329_v0 = vld [vmem:[%s1671_s20] sm:$0xf] (%p1648_p3)  ;;  %v331_v1 = vld [vmem:[%s1671_s20 + $0x8] sm:$0xf] (%p1648_p3)  ;;  %v333_v2 = vld [vmem:[%s1671_s20 + $0x10] sm:$0xf] (%p1648_p3) }
  0x18   : > { %330 = vst [vmem:[%s309_s21] sm:$0xf] (%p1648_p3), %v329_v0  ;;  %332 = vst [vmem:[%s309_s21 + $0x4] sm:$0xf] (%p1648_p3), %v331_v1  ;;  %v335_v3 = vld [vmem:[%s1671_s20 + $0x18] sm:$0xf] (%p1648_p3) }
  0x19   : > { %334 = vst [vmem:[%s309_s21 + $0x8] sm:$0xf] %v333_v2  ;;  %v337_v4 = vld [vmem:[%s1671_s20 + $0x20] sm:$0xf]  ;;  %v339_v5 = vld [vmem:[%s1671_s20 + $0x28] sm:$0xf] }
  0x1a   : > { %336 = vst [vmem:[%s309_s21 + $0xc] sm:$0xf] %v335_v3  ;;  %338 = vst [vmem:[%s309_s21 + $0x10] sm:$0xf] %v337_v4  ;;  %v341_v6 = vld [vmem:[%s1671_s20 + $0x30] sm:$0xf] }
  0x1b   : > { %340 = vst [vmem:[%s309_s21 + $0x14] sm:$0xf] %v339_v5  ;;  %v343_v7 = vld [vmem:[%s1671_s20 + $0x38] sm:$0xf]  ;;  %v345_v8 = vld [vmem:[%s1671_s20 + $0x40] sm:$0xf] }
  0x1c   : > { %342 = vst [vmem:[%s309_s21 + $0x18] sm:$0xf] %v341_v6  ;;  %344 = vst [vmem:[%s309_s21 + $0x1c] sm:$0xf] %v343_v7  ;;  %v347_v9 = vld [vmem:[%s1671_s20 + $0x48] sm:$0xf] }
  0x1d   : > { %346 = vst [vmem:[%s309_s21 + $0x20] sm:$0xf] %v345_v8  ;;  %v349_v10 = vld [vmem:[%s1671_s20 + $0x50] sm:$0xf]  ;;  %v351_v11 = vld [vmem:[%s1671_s20 + $0x58] sm:$0xf] }
  0x1e   : > { %348 = vst [vmem:[%s309_s21 + $0x24] sm:$0xf] %v347_v9  ;;  %350 = vst [vmem:[%s309_s21 + $0x28] sm:$0xf] %v349_v10  ;;  %v353_v12 = vld [vmem:[%s1671_s20 + $0x60] sm:$0xf] }
  0x1f   : > { %352 = vst [vmem:[%s309_s21 + $0x2c] sm:$0xf] %v351_v11  ;;  %v355_v13 = vld [vmem:[%s1671_s20 + $0x68] sm:$0xf]  ;;  %v357_v14 = vld [vmem:[%s1671_s20 + $0x70] sm:$0xf] }
  0x20   : > { %354 = vst [vmem:[%s309_s21 + $0x30] sm:$0xf] %v353_v12  ;;  %356 = vst [vmem:[%s309_s21 + $0x34] sm:$0xf] %v355_v13  ;;  %v359_v15 = vld [vmem:[%s1671_s20 + $0x78] sm:$0xf] }
  0x21   : > { %358 = vst [vmem:[%s309_s21 + $0x38] sm:$0xf] %v357_v14  ;;  %360 = vst [vmem:[%s309_s21 + $0x3c] sm:$0xf] %v359_v15 }
  0x22 PF: > { %415 = sbr.rel (!%p1648_p3) target bundleno = 61 (0x3d), region = 85  ;;  %s417_s22 = sand.u32 (%p1648_p3), 1, %s1530_s10  }
  0x23   : > { %s1288_s24 = sshll.u32 (%p1648_p3), %s1546_s14, 6  ;;  %s1287_s25 = sshll.u32 (%p1648_p3), %s417_s22, 7 }
  0x24   : > { %s421_s26 = sadd.s32 (%p1648_p3), %s1542_s13, %s1288_s24  ;;  %s1702_s18 = scalar_lea.vmem (%p1648_p3), [#allocation3], %s1287_s25 }
  0x25   : > { %s1289_s27 = sshll.u32 (%p1648_p3), %s421_s26, 2 }
  0x26   : > { %s1697_s19 = scalar_lea.vmem (%p1648_p3), %s1876_s1, %s1289_s27 }
  0x27   : > { %v439_v16 = vld [vmem:[%s1697_s19] sm:$0xf] (%p1648_p3)  ;;  %v441_v17 = vld [vmem:[%s1697_s19 + $0x8] sm:$0xf] (%p1648_p3)  ;;  %v443_v18 = vld [vmem:[%s1697_s19 + $0x10] sm:$0xf] (%p1648_p3) }
  0x28   : > { %440 = vst [vmem:[%s1702_s18] sm:$0xf] (%p1648_p3), %v439_v16  ;;  %442 = vst [vmem:[%s1702_s18 + $0x4] sm:$0xf] (%p1648_p3), %v441_v17  ;;  %v445_v19 = vld [vmem:[%s1697_s19 + $0x18] sm:$0xf] (%p1648_p3) }
  0x29   : > { %444 = vst [vmem:[%s1702_s18 + $0x8] sm:$0xf] %v443_v18  ;;  %v447_v20 = vld [vmem:[%s1697_s19 + $0x20] sm:$0xf]  ;;  %v449_v21 = vld [vmem:[%s1697_s19 + $0x28] sm:$0xf] }
  0x2a   : > { %446 = vst [vmem:[%s1702_s18 + $0xc] sm:$0xf] %v445_v19  ;;  %448 = vst [vmem:[%s1702_s18 + $0x10] sm:$0xf] %v447_v20  ;;  %v451_v22 = vld [vmem:[%s1697_s19 + $0x30] sm:$0xf] }
  0x2b   : > { %450 = vst [vmem:[%s1702_s18 + $0x14] sm:$0xf] %v449_v21  ;;  %v453_v23 = vld [vmem:[%s1697_s19 + $0x38] sm:$0xf]  ;;  %v455_v24 = vld [vmem:[%s1697_s19 + $0x40] sm:$0xf] }
  0x2c   : > { %452 = vst [vmem:[%s1702_s18 + $0x18] sm:$0xf] %v451_v22  ;;  %454 = vst [vmem:[%s1702_s18 + $0x1c] sm:$0xf] %v453_v23  ;;  %v457_v25 = vld [vmem:[%s1697_s19 + $0x48] sm:$0xf] }
  0x2d   : > { %456 = vst [vmem:[%s1702_s18 + $0x20] sm:$0xf] %v455_v24  ;;  %v459_v26 = vld [vmem:[%s1697_s19 + $0x50] sm:$0xf]  ;;  %v461_v27 = vld [vmem:[%s1697_s19 + $0x58] sm:$0xf] }
  0x2e   : > { %458 = vst [vmem:[%s1702_s18 + $0x24] sm:$0xf] %v457_v25  ;;  %460 = vst [vmem:[%s1702_s18 + $0x28] sm:$0xf] %v459_v26  ;;  %v463_v28 = vld [vmem:[%s1697_s19 + $0x60] sm:$0xf] }
  0x2f   : > { %462 = vst [vmem:[%s1702_s18 + $0x2c] sm:$0xf] %v461_v27  ;;  %v465_v29 = vld [vmem:[%s1697_s19 + $0x68] sm:$0xf]  ;;  %v467_v30 = vld [vmem:[%s1697_s19 + $0x70] sm:$0xf] }
  0x30   : > { %464 = vst [vmem:[%s1702_s18 + $0x30] sm:$0xf] %v463_v28  ;;  %466 = vst [vmem:[%s1702_s18 + $0x34] sm:$0xf] %v465_v29  ;;  %v469_v31 = vld [vmem:[%s1697_s19 + $0x78] sm:$0xf] }
  0x31   : > { %468 = vst [vmem:[%s1702_s18 + $0x38] sm:$0xf] %v467_v30  ;;  %v471_v32 = vld [vmem:[%s1697_s19 + $0x80] sm:$0xf]  ;;  %v473_v33 = vld [vmem:[%s1697_s19 + $0x88] sm:$0xf] }
  0x32   : > { %470 = vst [vmem:[%s1702_s18 + $0x3c] sm:$0xf] %v469_v31  ;;  %472 = vst [vmem:[%s1702_s18 + $0x40] sm:$0xf] %v471_v32  ;;  %v475_v34 = vld [vmem:[%s1697_s19 + $0x90] sm:$0xf] }
  0x33   : > { %474 = vst [vmem:[%s1702_s18 + $0x44] sm:$0xf] %v473_v33  ;;  %v477_v35 = vld [vmem:[%s1697_s19 + $0x98] sm:$0xf]  ;;  %v479_v36 = vld [vmem:[%s1697_s19 + $0xa0] sm:$0xf] }
  0x34   : > { %476 = vst [vmem:[%s1702_s18 + $0x48] sm:$0xf] %v475_v34  ;;  %478 = vst [vmem:[%s1702_s18 + $0x4c] sm:$0xf] %v477_v35  ;;  %v481_v37 = vld [vmem:[%s1697_s19 + $0xa8] sm:$0xf] }
  0x35   : > { %480 = vst [vmem:[%s1702_s18 + $0x50] sm:$0xf] %v479_v36  ;;  %v483_v38 = vld [vmem:[%s1697_s19 + $0xb0] sm:$0xf]  ;;  %v485_v39 = vld [vmem:[%s1697_s19 + $0xb8] sm:$0xf] }
  0x36   : > { %482 = vst [vmem:[%s1702_s18 + $0x54] sm:$0xf] %v481_v37  ;;  %484 = vst [vmem:[%s1702_s18 + $0x58] sm:$0xf] %v483_v38  ;;  %v487_v40 = vld [vmem:[%s1697_s19 + $0xc0] sm:$0xf] }
  0x37   : > { %486 = vst [vmem:[%s1702_s18 + $0x5c] sm:$0xf] %v485_v39  ;;  %v489_v41 = vld [vmem:[%s1697_s19 + $0xc8] sm:$0xf]  ;;  %v491_v42 = vld [vmem:[%s1697_s19 + $0xd0] sm:$0xf] }
  0x38   : > { %488 = vst [vmem:[%s1702_s18 + $0x60] sm:$0xf] %v487_v40  ;;  %490 = vst [vmem:[%s1702_s18 + $0x64] sm:$0xf] %v489_v41  ;;  %v493_v43 = vld [vmem:[%s1697_s19 + $0xd8] sm:$0xf] }
  0x39   : > { %492 = vst [vmem:[%s1702_s18 + $0x68] sm:$0xf] %v491_v42  ;;  %v495_v44 = vld [vmem:[%s1697_s19 + $0xe0] sm:$0xf]  ;;  %v497_v45 = vld [vmem:[%s1697_s19 + $0xe8] sm:$0xf] }
  0x3a   : > { %494 = vst [vmem:[%s1702_s18 + $0x6c] sm:$0xf] %v493_v43  ;;  %496 = vst [vmem:[%s1702_s18 + $0x70] sm:$0xf] %v495_v44  ;;  %v499_v46 = vld [vmem:[%s1697_s19 + $0xf0] sm:$0xf] }
  0x3b   : > { %498 = vst [vmem:[%s1702_s18 + $0x74] sm:$0xf] %v497_v45  ;;  %v501_v47 = vld [vmem:[%s1697_s19 + $0xf8] sm:$0xf]  ;;  %500 = vst [vmem:[%s1702_s18 + $0x78] sm:$0xf] %v499_v46 }
  0x3c   : > { %502 = vst [vmem:[%s1702_s18 + $0x7c] sm:$0xf] %v501_v47 }
  0x3d PF: > { %p1290_p7 = scmp.ge.s32.totalorder %s1550_s15, 1  ;;  %p588_p8 = scmp.lt.s32.totalorder %s1550_s15, 5 }
  0x3f   : > { %p589_p9 = pnand %p1290_p7, %p588_p8 }
  0x40   : > { %s595_s20 = sand.u32 (!%p589_p9), 1, %s1526_s30   ;;  %v1474_v48 = vld [vmem:[%s1877_s2] sm:$0xff] (!%p589_p9)   ;;  %v1552_v51 = vmov (!%p589_p9), 0   ;;  %v695_v55 = vld [vmem:[%s1878_s3 + $0x10] sm:$0xff] (!%p589_p9)  ;;  %v694_v56 = vld [vmem:[%s1878_s3 + $0x8] sm:$0xff] (!%p589_p9)  ;;  %v1553_v7 = vmov (!%p589_p9), 0.0  }
  0x41   : > { %592 = sbr.rel (%p589_p9) target bundleno = 586 (0x24a), region = 126  ;;  %s1291_s24 = sshll.u32 (!%p589_p9), %s595_s20, 6  ;;  %1385 = vmatprep.mubr.bf16.mxu0 (!%p589_p9), %v1474_v48  ;;  %1464 = vset.pattern.permute.xlu0 (!%p589_p9), %v1552_v51  ;;  %v693_v54 = vld [vmem:[%s1878_s3] sm:$0xff] (!%p589_p9)  ;;  %v696_v57 = vld [vmem:[%s1878_s3 + $0x18] sm:$0xff] (!%p589_p9)  ;;  %v698_v60 = vld [vmem:[%s1878_s3 + $0x28] sm:$0xff] (!%p589_p9)  ;;  %vm1554_vm0 = vmmov (!%p589_p9), 0  }
  0x42   : > { %s1771_s25 = scalar_lea.vmem (!%p589_p9), [#allocation2], %s1291_s24  ;;  %1465 = vset.pattern.permute.xlu1 (!%p589_p9), %v1552_v51  ;;  %s1292_s30 = sshll.u32 (!%p589_p9), %s595_s20, 7  ;;  %703 = vperm.xlu0 (!%p589_p9), %1464, %v693_v54   ;;  %v697_v59 = vld [vmem:[%s1878_s3 + $0x20] sm:$0xff] (!%p589_p9)  ;;  %v699_v62 = vld [vmem:[%s1878_s3 + $0x30] sm:$0xff] (!%p589_p9)  ;;  %v700_v63 = vld [vmem:[%s1878_s3 + $0x38] sm:$0xff] (!%p589_p9)  ;;  %vm897_vm1 = vcmask (!%p589_p9), 523264  }
  0x43   : > { %v1466_v49 = vld [vmem:[%s1771_s25] sm:$0xff] (!%p589_p9)   ;;  %v1467_v50 = vld [vmem:[%s1771_s25 + $0x8] sm:$0xff] (!%p589_p9)   ;;  %v1468_v52 = vld [vmem:[%s1771_s25 + $0x10] sm:$0xff] (!%p589_p9)   ;;  %713 = vperm.xlu1 (!%p589_p9), %1465, %v695_v55   ;;  %s1790_s22 = scalar_lea.vmem (!%p589_p9), [#allocation3], %s1292_s30  ;;  %1393 = vmatprep.subr.bf16.mxu1 (!%p589_p9), %v1553_v7  ;;  %p652_p10 = scmp.lt.s32.totalorder (!%p589_p9), %s1538_s12, 1 }
  0x44   : > { %1369 = vmatprep.subr.bf16.mxu0 (!%p589_p9), %v1466_v49  ;;  %v1469_v53 = vld [vmem:[%s1771_s25 + $0x18] sm:$0xff] (!%p589_p9)   ;;  %v1470_v58 = vld [vmem:[%s1771_s25 + $0x20] sm:$0xff] (!%p589_p9)   ;;  %v1471_v61 = vld [vmem:[%s1771_s25 + $0x28] sm:$0xff] (!%p589_p9)   ;;  %1401 = vmatprep.mubr.msk.bf16.mxu1 (!%p589_p9), %vm1554_vm0, %v1553_v7  ;;  %p654_p11 = scmp.lt.s32.totalorder (!%p589_p9), %s1534_s11, 1 }
  0x45   : > { %1370 = vmatpush3.bf16.msra.mxu0 (!%p589_p9), %v1466_v49  ;;  %v1472_v0 = vld [vmem:[%s1771_s25 + $0x30] sm:$0xff] (!%p589_p9)   ;;  %v891_v1 = vld [vmem:[%s1880_s5] sm:$0xff] (!%p589_p9)  ;;  %v1473_v3 = vld [vmem:[%s1771_s25 + $0x38] sm:$0xff] (!%p589_p9)  }
  0x46   : > { %1371 = vmatprep.subr.bf16.mxu0 (!%p589_p9), %v1467_v50  ;;  %708 = vperm.xlu0 (!%p589_p9), %1464, %v694_v56   ;;  %v975_v2 = vld [vmem:[%s1882_s7] sm:$0xff] (!%p589_p9)  ;;  %v1475_v4 = vld [vmem:[%s1877_s2 + $0x8] sm:$0xff] (!%p589_p9)   ;;  %v1476_v5 = vld [vmem:[%s1877_s2 + $0x10] sm:$0xff] (!%p589_p9)  }
  0x47   : > { %718 = vperm.xlu1 (!%p589_p9), %1465, %v696_v57   ;;  %v1477_v6 = vld [vmem:[%s1877_s2 + $0x18] sm:$0xff] (!%p589_p9)   ;;  %v1478_v44 = vld [vmem:[%s1790_s22 + $0x40] sm:$0xff] (!%p589_p9)   ;;  %v1480_v49 = vld [vmem:[%s1790_s22 + $0x48] sm:$0xff] (!%p589_p9)  }
  0x48   : > { %v974_v45 = vld [vmem:[%s1881_s6] sm:$0xff]  ;;  %v1482_v51 = vld [vmem:[%s1790_s22 + $0x50] sm:$0xff]   ;;  %v1485_v54 = vld [vmem:[%s1790_s22 + $0x18] sm:$0xff]   ;;  %s1899_s12 = smov (!%p652_p10, %s1538_s12), 1  ;;  %s1901_s11 = smov (!%p654_p11, %s1534_s11), 1 }
  0x49   : > { %1372 = vmatpush3.bf16.msra.mxu0 %v1467_v50  ;;  %v886_v46 = vld [vmem:[%s1879_s4] sm:$0xf]  ;;  %v1311_v48 = vcombine.high %v974_v45, %v974_v45  ;;  %v1481_v50 = vld [vmem:[%s1790_s22 + $0x8] sm:$0xff]   ;;  %s1293_s26 = sshll.u32 %s1899_s12, 1 }
  0x4a   : > { %1373 = vmatprep.subr.bf16.mxu0 %v1468_v52  ;;  %723 = vperm.xlu0 %1464, %v697_v59   ;;  %v1479_v47 = vld [vmem:[%s1790_s22] sm:$0xff]   ;;  %v1488_v57 = vld [vmem:[%s1790_s22 + $0x68] sm:$0xff]   ;;  %v1490_v59 = vld [vmem:[%s1790_s22 + $0x70] sm:$0xff]   ;;  %s657_s27 = sadd.s32 %s1293_s26, %s1901_s11 }
  0x4b   : > { %728 = vperm.xlu1 %1465, %v698_v60   ;;  %v1486_v55 = vld [vmem:[%s1790_s22 + $0x60] sm:$0xff]   ;;  %v1491_v60 = vld [vmem:[%s1790_s22 + $0x30] sm:$0xff]   ;;  %s1294_s28 = sshll.u32 %s657_s27, 3 }
  0x4c   : > { %v1487_v56 = vld [vmem:[%s1790_s22 + $0x20] sm:$0xff]   ;;  %s659_s30 = scalar_lea.vmem %s1883_s8, %s1294_s28  ;;  %s667_s11 = scalar_lea.vmem %s1884_s9, %s1294_s28 }
  0x4d   : > { %1374 = vmatpush3.bf16.msra.mxu0 %v1468_v52  ;;  %v1483_v52 = vld [vmem:[%s1790_s22 + $0x10] sm:$0xff]  }
  0x4e   : > { %1375 = vmatprep.subr.bf16.mxu0 %v1469_v53  ;;  %733 = vperm.xlu0 %1464, %v699_v62   ;;  %v1493_v62 = vld [vmem:[%s1790_s22 + $0x38] sm:$0xff]  }
  0x4f   : > { %738 = vperm.xlu1 %1465, %v700_v63   ;;  %v1310_v63 = vcombine.low %v974_v45, %v974_v45 }
  0x51   : > { %1376 = vmatpush3.bf16.msra.mxu0 %v1469_v53  ;;  %v1484_v53 = vld [vmem:[%s1790_s22 + $0x58] sm:$0xff]  }
  0x52   : > { %1377 = vmatprep.subr.bf16.mxu0 %v1470_v58  ;;  %894 = vperm.xlu0 %1464, %v891_v1  }
  0x53   : > { %978 = vperm.xlu1 %1465, %v975_v2  }
  0x55   : > { %1378 = vmatpush3.bf16.msra.mxu0 %v1470_v58  ;;  %v1489_v58 = vld [vmem:[%s1790_s22 + $0x28] sm:$0xff]  }
  0x56   : > { %1379 = vmatprep.subr.bf16.mxu0 %v1471_v61 }
  0x59   : > { %1380 = vmatpush3.bf16.msra.mxu0 %v1471_v61  ;;  %v1492_v61 = vld [vmem:[%s1790_s22 + $0x78] sm:$0xff]  }
  0x5a   : > { %1381 = vmatprep.subr.bf16.mxu0 %v1472_v0 }
  0x5d   : > { %1382 = vmatpush3.bf16.msra.mxu0 %v1472_v0 }
  0x5e   : > { %1383 = vmatprep.subr.bf16.mxu0 %v1473_v3 }
  0x61   : > { %1384 = vmatpush3.bf16.msra.mxu0 %v1473_v3 }
  0x64   : > { %1386 = vmatmul.mubr.bf16.vlgmr.msra.gmra.mrb[0].mxu0 %v1475_v4 }
  0x65   : > { %1389 = vmatprep.mubr.bf16.mxu0 %v1476_v5 }
  0x6c   : > { %1390 = vmatmul.mubr.bf16.gmra.mrb[4].mxu0 %v1477_v6 }
  0xc1   : > { %v704_v8 = vpop.permute.xlu0 %703 }
  0xc2   : > { %v714_v9 = vpop.permute.xlu1 %713 }
  0xc5   : > { %v709_v10 = vpop.permute.xlu0 %708 }
  0xc6   : > { %v719_v11 = vpop.permute.xlu1 %718 }
  0xc9   : > { %v724_v15 = vpop.permute.xlu0 %723 }
  0xca   : > { %v729_v20 = vpop.permute.xlu1 %728 }
  0xcd   : > { %v734_v27 = vpop.permute.xlu0 %733 }
  0xce   : > { %v739_v32 = vpop.permute.xlu1 %738 }
  0xd1   : > { %v895_v0 = vpop.permute.xlu0 %894 }
 0x137   : > { %v1387_v12 = vpop.f32.mrb[0].mxu0 }
 0x138   : > { %v856_v13 = vadd.f32 %v1387_v12, %v714_v9  ;;  %v847_v14 = vpop.f32.mrb[1].mxu0 }
 0x139   : > { %v848_v16 = vadd.f32 %v847_v14, %v704_v8  ;;  %v1388_v17 = vpop.f32.mrb[2].mxu0 }
 0x13a   : > { %v859_v18 = vadd.f32 %v1388_v17, %v719_v11  ;;  %v850_v19 = vpop.f32.mrb[3].mxu0  ;;  %v880_v22 = vmax.f32 %v856_v13, 0.0 }
 0x13b   : > { %v851_v21 = vadd.f32 %v850_v19, %v709_v10  ;;  %v878_v24 = vmax.f32 %v848_v16, 0.0  ;;  %v979_v10 = vpop.permute.xlu1 %978 }
 0x13c   : > { %v881_v23 = vmax.f32 %v859_v18, 0.0 }
 0x13d   : > { %v879_v25 = vmax.f32 %v851_v21, 0.0 }
 0x13e   : > { %v888_v26 = vpack.c.bf16 %v881_v23, %v880_v22 }
 0x13f   : > { %v1391_v28 = vpop.f32.mrb[4].mxu0  ;;  %v887_v29 = vpack.c.bf16 %v879_v25, %v878_v24 }
 0x140   : > { %v872_v30 = vadd.f32 %v1391_v28, %v734_v27  ;;  %v863_v31 = vpop.f32.mrb[5].mxu0 }
 0x141   : > { %v864_v33 = vadd.f32 %v863_v31, %v724_v15  ;;  %v1392_v34 = vpop.f32.mrb[6].mxu0  ;;  %1394 = vmatpush3.bf16.msra.mxu1 %v887_v29 }
 0x142   : > { %v875_v35 = vadd.f32 %v1392_v34, %v739_v32  ;;  %v866_v36 = vpop.f32.mrb[7].mxu0  ;;  %1395 = vmatprep.subr.bf16.mxu1 %v1553_v7  ;;  %v884_v38 = vmax.f32 %v872_v30, 0.0 }
 0x143   : > { %v867_v37 = vadd.f32 %v866_v36, %v729_v20  ;;  %v882_v40 = vmax.f32 %v864_v33, 0.0 }
 0x144   : > { %v885_v39 = vmax.f32 %v875_v35, 0.0 }
 0x145   : > { %v883_v41 = vmax.f32 %v867_v37, 0.0  ;;  %1396 = vmatpush3.bf16.msra.mxu1 %v888_v26 }
 0x146   : > { %v890_v42 = vpack.c.bf16 %v885_v39, %v884_v38  ;;  %1397 = vmatprep.subr.bf16.mxu1 %v1553_v7 }
 0x147   : > { %v889_v43 = vpack.c.bf16 %v883_v41, %v882_v40 }
 0x149   : > { %1398 = vmatpush3.bf16.msra.mxu1 %v889_v43 }
 0x14a   : > { %1399 = vmatprep.subr.bf16.mxu1 %v1553_v7 }
 0x14d   : > { %1400 = vmatpush3.bf16.msra.mxu1 %v890_v42 }
 0x14e   : > { %1347 = vmatprep.subr.bf16.mxu1 %v1478_v44 }
 0x150   : > { %1402 = vmatmul.mubr.msk.bf16.vlgmr.msra.gmra.mrb[0].mxu1 %vm897_vm1, %v886_v46 }
 0x151   : > { %1348 = vmatpush3.bf16.msra.mxu1 %v1479_v47  ;;  %1116 = vmatprep.mubr.bf16.mxu1 %v1311_v48 }
 0x152   : > { %1349 = vmatprep.subr.bf16.mxu1 %v1480_v49 }
 0x155   : > { %1350 = vmatpush3.bf16.msra.mxu1 %v1481_v50 }
 0x156   : > { %1351 = vmatprep.subr.bf16.mxu1 %v1482_v51 }
 0x159   : > { %1352 = vmatpush3.bf16.msra.mxu1 %v1483_v52 }
 0x15a   : > { %1353 = vmatprep.subr.bf16.mxu1 %v1484_v53 }
 0x15d   : > { %1354 = vmatpush3.bf16.msra.mxu1 %v1485_v54 }
 0x15e   : > { %1355 = vmatprep.subr.bf16.mxu1 %v1486_v55 }
 0x161   : > { %1356 = vmatpush3.bf16.msra.mxu1 %v1487_v56 }
 0x162   : > { %1357 = vmatprep.subr.bf16.mxu1 %v1488_v57 }
 0x165   : > { %1358 = vmatpush3.bf16.msra.mxu1 %v1489_v58 }
 0x166   : > { %1359 = vmatprep.subr.bf16.mxu1 %v1490_v59 }
 0x169   : > { %1360 = vmatpush3.bf16.msra.mxu1 %v1491_v60 }
 0x16a   : > { %1361 = vmatprep.subr.bf16.mxu1 %v1492_v61 }
 0x16d   : > { %1362 = vmatpush3.bf16.msra.mxu1 %v1493_v62 }
 0x170   : > { %1117 = vmatmul.mubr.bf16.vlgmr.msra.gmra.mrb[4].mxu1 %v1310_v63 }
 0x223   : > { %v935_v1 = vpop.f32.mrb[0].mxu1 }
 0x224   : > { %v936_v2 = vadd.f32 %v935_v1, %v895_v0  ;;  %v1403_v3 = vpop.f32.mrb[1].mxu1 }
 0x225   : > { %v938_v4 = vpop.f32.mrb[2].mxu1 }
 0x226   : > { %941 = vst [vmem:[%s659_s30] sm:$0xff] %v936_v2  ;;  %v1404_v5 = vpop.f32.mrb[3].mxu1 }
 0x243   : > { %v1363_v6 = vpop.f32.mrb[4].mxu1 }
 0x244   : > { %v1364_v7 = vpop.f32.mrb[5].mxu1 }
 0x245   : > { %v1365_v8 = vadd.f32 %v1364_v7, %v1363_v6  ;;  %v1366_v9 = vpop.f32.mrb[6].mxu1 }
 0x246   : > { %v1367_v11 = vpop.f32.mrb[7].mxu1 }
 0x247   : > { %v1119_v12 = vadd.f32 %v1365_v8, %v979_v10 }
 0x249   : > { %1124 = vst [vmem:[%s667_s11] sm:$0xff] %v1119_v12 }
 0x24a PF: > { %s20_s15 = sadd.s32 1, %s1550_s15   ;;  %s1886_s30 = smov %s1530_s10 }
 0x24b   : > { %p17_p12 = scmp.ge.s32.totalorder %s20_s15, 6   ;;  %s1887_s10 = smov %s1660_s23 }
 0x24c   : > { %s1888_s11 = smov %s1542_s13  ;;  %s1889_s12 = smov %s1546_s14 }
 0x24d   : > { %s1890_s13 = smov %s1893_s16  ;;  %s1891_s14 = smov %s1897_s17 }
 0x24e   :  { %19 = sbr.rel (!%p17_p12) target bundleno = 4 (0x4), region = 189 }

</bundles_post_ra>
